<compile_context>
chip_gen: v6e
topology: v6e:2x2x1
jax: 0.10.0
libtpu: 0.0.40
codegen_flags: <defaults>
</compile_context>

<pallas_src>
import jax
import jax.numpy as jnp
from jax.experimental import pallas as pl
from jax.experimental.pallas import tpu as pltpu


def dfu_kernel(ids_ref, r_ref, viota_ref, g_ref, w2_ref, sel_ref, bcast_ref, mc_ref, b_ref, o_ref):
    """Fused LiteratureEmbedding + Linear for one batch tile.

    ids_ref   : (TB, 2S)  int32  [src ids | seg ids]            (the only pipelined HBM stream)
    r_ref     : (2S, LP)  f32    routing matrix: id column -> its one-hot lane block
    viota_ref : (1, LP)   f32    vocab index of each one-hot lane (-1 on pad lanes)
    g_ref     : (LP, 2ES) bf16   one-hot lane -> [x | y] flat embedding values
    w2_ref    : (1, 2ES)  f32    w[j % S] on the x half, 1.0 on the y half
    sel_ref   : (2ES, 2S) f32    0/1: reduce over the view's "E" axis (per view-"S" index, per half)
    bcast_ref : (2S, 2ES) f32    sel^T: broadcast the per-index reciprocal norms back
    mc_ref    : (2ES, E)  f32    fused (.sum(-1)) @ W^T, both halves
    b_ref     : (1, E)    f32    Linear bias
    o_ref     : (TB, E)   f32
    """
    eps = 1e-12  # F.normalize default

    # ---- in-kernel embedding gather: exact one-hot (MXU) ----
    idsf = ids_ref[...].astype(jnp.float32)                                   # (TB, 2S)
    # broadcast each id onto its V (or 3) one-hot lanes; f32 keeps ids exact for any vocab < 2^24
    ids_b = jnp.dot(idsf, r_ref[...], preferred_element_type=jnp.float32)     # (TB, LP)
    oh = jnp.where(jnp.abs(ids_b - viota_ref[...]) < 0.5, 1.0, 0.0).astype(jnp.bfloat16)
    # gather: exactly one nonzero per (position, half) block -> exact row select; bf16 MXU, f32 acc
    xy = jnp.dot(oh, g_ref[...], preferred_element_type=jnp.float32)          # (TB, 2ES) = [x | y]
    xy = xy * w2_ref[...]                                                     # w scales the x half

    # ---- F.normalize over the view's "E" axis (strided lane-group reduce via 0/1 matmul) ----
    nsq = jnp.dot(xy * xy, sel_ref[...], preferred_element_type=jnp.float32)  # (TB, 2S)
    # max(sqrt(s), eps) == sqrt(max(s, eps^2)); rsqrt stays on the small tensor (EUP slot)
    rinv = jax.lax.rsqrt(jnp.maximum(nsq, eps * eps))                         # (TB, 2S)
    rb = jnp.dot(rinv, bcast_ref[...], preferred_element_type=jnp.float32)    # (TB, 2ES)
    z = xy * rb                                                               # [x_norm | y_norm]

    # ---- fused (.sum(-1) over the view's "S" axis) + Linear(E, E) ----
    o_ref[...] = jnp.dot(z, mc_ref[...], preferred_element_type=jnp.float32) + b_ref[...]
    # TODO(synk): Dropout(0.5) is stochastic; implemented as identity (eval mode).


def _round_up(x, m):
    return (x + m - 1) // m * m


def normal_dfu_forward(src, seg, params, *, max_batch_tile=2048):
    """src, seg: int32 (B, S) token / segment ids. Returns (B, E) float32."""
    B, S = src.shape
    V, E = params["src_emb"].shape
    Vs = params["seg_emb"].shape[0]
    ES = E * S
    L = S * (V + Vs)                      # one-hot lanes: S src blocks of V + S seg blocks of Vs
    LP = _round_up(L, 128)                # lane-dense one-hot width
    # TODO(synk): the one-hot gather assumes a small vocab (the (LP, 2ES) table fits VMEM); a large
    # vocab needs a manual-DMA row gather (memory_space=pl.ANY + pltpu.make_async_copy) instead.

    f32 = jnp.float32

    # ---- resident constants (KB-scale; DMA'd once via constant index maps) ----
    j = jnp.arange(ES)
    s_of_j = j // E                       # token position of flat index j (memory layout s*E + e)
    e_of_j = j % E                        # embedding dim of flat index j

    l = jnp.arange(LP)
    is_src = l < S * V
    is_seg = (l >= S * V) & (l < L)
    s_of_l = jnp.where(is_src, l // V, jnp.where(is_seg, (l - S * V) // Vs, -1))
    v_of_l = jnp.where(is_src, l % V, jnp.where(is_seg, (l - S * V) % Vs, 0))
    col_of_l = jnp.where(is_src, s_of_l, jnp.where(is_seg, S + s_of_l, -1))

    R = (col_of_l[None, :] == jnp.arange(2 * S)[:, None]).astype(f32)           # (2S, LP)
    viota = jnp.where(is_src | is_seg, v_of_l, -1).astype(f32).reshape(1, LP)   # (1, LP)

    # one-hot lane -> flat [x | y] embedding values (values carry bf16 rounding, as before)
    src_vals = params["src_emb"].astype(jnp.bfloat16).astype(f32)
    seg_vals = params["seg_emb"].astype(jnp.bfloat16).astype(f32)
    match = s_of_l[:, None] == s_of_j[None, :]                                  # (LP, ES)
    gx = jnp.where(match & is_src[:, None], src_vals[jnp.clip(v_of_l, 0, V - 1)][:, e_of_j], 0.0)
    gy = jnp.where(match & is_seg[:, None], seg_vals[jnp.clip(v_of_l, 0, Vs - 1)][:, e_of_j], 0.0)
    G = jnp.concatenate([gx, gy], axis=1).astype(jnp.bfloat16)                  # (LP, 2ES)

    jc = jnp.arange(2 * ES)
    half_of_jc = jc // ES                 # 0 = x half, 1 = y half
    k_of_jc = jc % S                      # view's "S" index (ES is a multiple of S)
    i_of_jc = (jc % ES) // S              # view's "E" index
    k2 = jnp.arange(2 * S)
    SEL = ((k_of_jc[:, None] == (k2[None, :] % S)) &
           (half_of_jc[:, None] == (k2[None, :] // S))).astype(f32)             # (2ES, 2S)
    BCAST = SEL.T                                                               # (2S, 2ES)
    w2 = jnp.where(half_of_jc == 0,
                   params["w"].astype(f32)[k_of_jc], 1.0).reshape(1, 2 * ES)    # (1, 2ES)
    MC = params["lin_w"].astype(f32).T[i_of_jc]                                 # (2ES, E)
    bias = params["lin_b"].astype(f32).reshape(1, E)

    # ---- id stream (the only per-row HBM input); pad ONLY this tiny slab if needed ----
    cid = jnp.concatenate([src, seg], axis=1).astype(jnp.int32)                 # (B, 2S)

    # Batch tile: count the live (TB, 2ES)/(TB, LP) f32 intermediates + the bf16 one-hot + the
    # lane-padded double-buffered id/out blocks; keep them inside a ~32 MiB budget (the explicit
    # vmem_limit_bytes below raises the scoped limit; v7x has 64 MiB physical, v5e/v6e 128 MiB).
    row_bytes = 4 * (3 * 2 * ES + LP) + 2 * LP + 4 * 4 * 128
    tb_cap = max(8, ((32 << 20) // row_bytes // 8) * 8)
    TB = max(8, (min(max_batch_tile, tb_cap, _round_up(B, 8)) // 8) * 8)
    B_pad = _round_up(B, TB)
    if B_pad != B:
        cid = jnp.pad(cid, ((0, B_pad - B), (0, 0)))   # padded rows gather id 0: finite, discarded

    flops_per_row = 2 * (2 * S * LP + LP * 2 * ES + 2 * ES * 2 * S + 2 * S * 2 * ES + 2 * ES * E)
    const_bytes = 4 * (R.size + viota.size + w2.size + SEL.size + BCAST.size + MC.size + bias.size) \
        + 2 * G.size
    cost = pl.CostEstimate(
        flops=int(B_pad) * int(flops_per_row),
        transcendentals=int(B_pad) * 2 * S,
        bytes_accessed=int(B_pad) * (2 * S * 4 + E * 4) + int(const_bytes),
    )

    out = pl.pallas_call(
        dfu_kernel,
        out_shape=jax.ShapeDtypeStruct((B_pad, E), jnp.float32),
        grid=(B_pad // TB,),
        in_specs=[
            pl.BlockSpec((TB, 2 * S), lambda i: (i, 0)),      # ids (pipelined over batch)
            pl.BlockSpec((2 * S, LP), lambda i: (0, 0)),      # R        (resident)
            pl.BlockSpec((1, LP), lambda i: (0, 0)),          # viota    (resident)
            pl.BlockSpec((LP, 2 * ES), lambda i: (0, 0)),     # G        (resident)
            pl.BlockSpec((1, 2 * ES), lambda i: (0, 0)),      # w2       (resident)
            pl.BlockSpec((2 * ES, 2 * S), lambda i: (0, 0)),  # SEL      (resident)
            pl.BlockSpec((2 * S, 2 * ES), lambda i: (0, 0)),  # BCAST    (resident)
            pl.BlockSpec((2 * ES, E), lambda i: (0, 0)),      # MC       (resident)
            pl.BlockSpec((1, E), lambda i: (0, 0)),           # bias     (resident)
        ],
        out_specs=pl.BlockSpec((TB, E), lambda i: (i, 0)),
        compiler_params=pltpu.CompilerParams(
            dimension_semantics=("parallel",),                # v7x: shard batch tiles over both TCs
            vmem_limit_bytes=48 * 1024 * 1024,
        ),
        cost_estimate=cost,
    )(cid, R, viota, G, w2, SEL, BCAST, MC, bias)

    return out[:B] if B_pad != B else out


def init_params(key, vocab_size, emb_size, seq_length):
    k1, k2, k3, k4, k5 = jax.random.split(key, 5)
    return {
        "src_emb": jax.random.normal(k1, (vocab_size, emb_size), jnp.float32),
        "seg_emb": jax.random.normal(k2, (3, emb_size), jnp.float32),
        # torch init is ones(seq_length); perturb slightly so the w-broadcast path is exercised.
        "w": 1.0 + 0.1 * jax.random.normal(k5, (seq_length,), jnp.float32),
        "lin_w": jax.random.normal(k3, (emb_size, emb_size), jnp.float32) * 0.1,
        "lin_b": jax.random.normal(k4, (emb_size,), jnp.float32) * 0.1,
    }


def _reference(src, seg, params):
    """Pure-JAX reference of the same math (embedding values carry the kernel's bf16 rounding)."""
    B, S = src.shape
    E = params["src_emb"].shape[1]
    eps = 1e-12
    src_tab = params["src_emb"].astype(jnp.bfloat16).astype(jnp.float32)
    seg_tab = params["seg_emb"].astype(jnp.bfloat16).astype(jnp.float32)
    xs = jnp.take(src_tab, src, axis=0).reshape(B, E, S)      # torch .view(-1, E, S)
    ys = jnp.take(seg_tab, seg, axis=0).reshape(B, E, S)
    x = params["w"].reshape(1, 1, S) * xs
    xn = x / jnp.maximum(jnp.linalg.norm(x, axis=1, keepdims=True), eps)
    yn = ys / jnp.maximum(jnp.linalg.norm(ys, axis=1, keepdims=True), eps)
    f = jnp.sum(xn + yn, axis=-1)
    return f @ params["lin_w"].T + params["lin_b"]


if __name__ == "__main__":
    # small shapes consistent with the module
    vocab_size, emb_size, seq_length, batch = 50, 32, 8, 2

    key = jax.random.PRNGKey(0)
    kp, ks, kg, ks2, kg2 = jax.random.split(key, 5)

    params = init_params(kp, vocab_size, emb_size, seq_length)
    src = jax.random.randint(ks, (batch, seq_length), 0, vocab_size, dtype=jnp.int32)
    seg = jax.random.randint(kg, (batch, seq_length), 0, 3, dtype=jnp.int32)

    out = jax.block_until_ready(normal_dfu_forward(src, seg, params))
    ref = _reference(src, seg, params)
    assert out.shape == (batch, emb_size)
    assert jnp.allclose(out, ref, atol=1e-2, rtol=1e-2), "mismatch vs reference"

    # Exercise the multi-tile grid + ragged-batch (id-only padding) path with a small forced tile.
    b2 = 18
    src2 = jax.random.randint(ks2, (b2, seq_length), 0, vocab_size, dtype=jnp.int32)
    seg2 = jax.random.randint(kg2, (b2, seq_length), 0, 3, dtype=jnp.int32)
    out2 = jax.block_until_ready(normal_dfu_forward(src2, seg2, params, max_batch_tile=8))
    ref2 = _reference(src2, seg2, params)
    assert out2.shape == (b2, emb_size)
    assert jnp.allclose(out2, ref2, atol=1e-2, rtol=1e-2), "mismatch vs reference (tiled)"

    print("KERNEL_OK")
</pallas_src>

<mosaic_0001>
module attributes {stable_mosaic.version = 11 : i64} {
  func.func @dfu_kernel(%arg0: i32, %arg1: memref<8x16xi32, #tpu.memory_space<vmem>>, %arg2: memref<16x512xf32, #tpu.memory_space<vmem>>, %arg3: memref<1x512xf32, #tpu.memory_space<vmem>>, %arg4: memref<512x512xbf16, #tpu.memory_space<vmem>>, %arg5: memref<1x512xf32, #tpu.memory_space<vmem>>, %arg6: memref<512x16xf32, #tpu.memory_space<vmem>>, %arg7: memref<16x512xf32, #tpu.memory_space<vmem>>, %arg8: memref<512x32xf32, #tpu.memory_space<vmem>>, %arg9: memref<1x32xf32, #tpu.memory_space<vmem>>, %arg10: memref<8x32xf32, #tpu.memory_space<vmem>>) attributes {dimension_semantics = [#tpu.dimension_semantics<parallel>], iteration_bounds = array<i64: 1>, scalar_prefetch = 0 : i64, scratch_operands = 0 : i64, tpu.core_type = #tpu.core_type<tc>, window_params = [{transform_indices = @transform_0, window_bounds = array<i64: 8, 16>}, {pipeline_mode = #tpu.pipeline_mode<synchronous>, transform_indices = @transform_1, window_bounds = array<i64: 16, 512>}, {pipeline_mode = #tpu.pipeline_mode<synchronous>, transform_indices = @transform_2, window_bounds = array<i64: 1, 512>}, {pipeline_mode = #tpu.pipeline_mode<synchronous>, transform_indices = @transform_3, window_bounds = array<i64: 512, 512>}, {pipeline_mode = #tpu.pipeline_mode<synchronous>, transform_indices = @transform_4, window_bounds = array<i64: 1, 512>}, {pipeline_mode = #tpu.pipeline_mode<synchronous>, transform_indices = @transform_5, window_bounds = array<i64: 512, 16>}, {pipeline_mode = #tpu.pipeline_mode<synchronous>, transform_indices = @transform_6, window_bounds = array<i64: 16, 512>}, {pipeline_mode = #tpu.pipeline_mode<synchronous>, transform_indices = @transform_7, window_bounds = array<i64: 512, 32>}, {pipeline_mode = #tpu.pipeline_mode<synchronous>, transform_indices = @transform_8, window_bounds = array<i64: 1, 32>}, {transform_indices = @transform_9, window_bounds = array<i64: 8, 32>}]} {
    %c0 = arith.constant 0 : index
    %c0_0 = arith.constant 0 : index
    %0 = vector.load %arg1[%c0, %c0_0] : memref<8x16xi32, #tpu.memory_space<vmem>>, vector<8x16xi32>
    %1 = arith.sitofp %0 : vector<8x16xi32> to vector<8x16xf32>
    %c0_1 = arith.constant 0 : index
    %c0_2 = arith.constant 0 : index
    %2 = vector.load %arg2[%c0_1, %c0_2] : memref<16x512xf32, #tpu.memory_space<vmem>>, vector<16x512xf32>
    %cst = arith.constant dense<0.000000e+00> : vector<8x512xf32>
    %3 = tpu.matmul %1, %2, %cst {dimension_numbers = #tpu.dot_dimension_numbers<[1], [0], [0], [1], [0, 0, 1, 1], [], []>} : vector<8x16xf32>, vector<16x512xf32>, vector<8x512xf32> -> vector<8x512xf32>
    %c0_3 = arith.constant 0 : index
    %c0_4 = arith.constant 0 : index
    %4 = vector.load %arg3[%c0_3, %c0_4] : memref<1x512xf32, #tpu.memory_space<vmem>>, vector<1x512xf32>
    %5 = vector.broadcast %4 : vector<1x512xf32> to vector<8x512xf32>
    %6 = arith.subf %3, %5 : vector<8x512xf32>
    %7 = math.absf %6 : vector<8x512xf32>
    %cst_5 = arith.constant 5.000000e-01 : f32
    %8 = vector.broadcast %cst_5 : f32 to vector<8x512xf32>
    %9 = arith.cmpf olt, %7, %8 : vector<8x512xf32>
    %cst_6 = arith.constant 1.000000e+00 : f32
    %cst_7 = arith.constant 0.000000e+00 : f32
    %10 = vector.broadcast %cst_6 : f32 to vector<8x512xf32>
    %11 = vector.broadcast %cst_7 : f32 to vector<8x512xf32>
    %12 = arith.select %9, %10, %11 : vector<8x512xi1>, vector<8x512xf32>
    %13 = arith.truncf %12 : vector<8x512xf32> to vector<8x512xbf16>
    %c0_8 = arith.constant 0 : index
    %c0_9 = arith.constant 0 : index
    %14 = vector.load %arg4[%c0_8, %c0_9] : memref<512x512xbf16, #tpu.memory_space<vmem>>, vector<512x512xbf16>
    %cst_10 = arith.constant dense<0.000000e+00> : vector<8x512xf32>
    %15 = tpu.matmul %13, %14, %cst_10 {dimension_numbers = #tpu.dot_dimension_numbers<[1], [0], [0], [1], [0, 0, 1, 1], [], []>} : vector<8x512xbf16>, vector<512x512xbf16>, vector<8x512xf32> -> vector<8x512xf32>
    %c0_11 = arith.constant 0 : index
    %c0_12 = arith.constant 0 : index
    %16 = vector.load %arg5[%c0_11, %c0_12] : memref<1x512xf32, #tpu.memory_space<vmem>>, vector<1x512xf32>
    %17 = vector.broadcast %16 : vector<1x512xf32> to vector<8x512xf32>
    %18 = arith.mulf %15, %17 : vector<8x512xf32>
    %19 = arith.mulf %18, %18 : vector<8x512xf32>
    %c0_13 = arith.constant 0 : index
    %c0_14 = arith.constant 0 : index
    %20 = vector.load %arg6[%c0_13, %c0_14] : memref<512x16xf32, #tpu.memory_space<vmem>>, vector<512x16xf32>
    %cst_15 = arith.constant dense<0.000000e+00> : vector<8x16xf32>
    %21 = tpu.matmul %19, %20, %cst_15 {dimension_numbers = #tpu.dot_dimension_numbers<[1], [0], [0], [1], [0, 0, 1, 1], [], []>} : vector<8x512xf32>, vector<512x16xf32>, vector<8x16xf32> -> vector<8x16xf32>
    %cst_16 = arith.constant 1.000000e-24 : f32
    %22 = vector.broadcast %cst_16 : f32 to vector<8x16xf32>
    %23 = arith.maximumf %21, %22 : vector<8x16xf32>
    %24 = math.rsqrt %23 : vector<8x16xf32>
    %c0_17 = arith.constant 0 : index
    %c0_18 = arith.constant 0 : index
    %25 = vector.load %arg7[%c0_17, %c0_18] : memref<16x512xf32, #tpu.memory_space<vmem>>, vector<16x512xf32>
    %cst_19 = arith.constant dense<0.000000e+00> : vector<8x512xf32>
    %26 = tpu.matmul %24, %25, %cst_19 {dimension_numbers = #tpu.dot_dimension_numbers<[1], [0], [0], [1], [0, 0, 1, 1], [], []>} : vector<8x16xf32>, vector<16x512xf32>, vector<8x512xf32> -> vector<8x512xf32>
    %27 = arith.mulf %18, %26 : vector<8x512xf32>
    %c0_20 = arith.constant 0 : index
    %c0_21 = arith.constant 0 : index
    %28 = vector.load %arg8[%c0_20, %c0_21] : memref<512x32xf32, #tpu.memory_space<vmem>>, vector<512x32xf32>
    %cst_22 = arith.constant dense<0.000000e+00> : vector<8x32xf32>
    %29 = tpu.matmul %27, %28, %cst_22 {dimension_numbers = #tpu.dot_dimension_numbers<[1], [0], [0], [1], [0, 0, 1, 1], [], []>} : vector<8x512xf32>, vector<512x32xf32>, vector<8x32xf32> -> vector<8x32xf32>
    %c0_23 = arith.constant 0 : index
    %c0_24 = arith.constant 0 : index
    %30 = vector.load %arg9[%c0_23, %c0_24] : memref<1x32xf32, #tpu.memory_space<vmem>>, vector<1x32xf32>
    %31 = vector.broadcast %30 : vector<1x32xf32> to vector<8x32xf32>
    %32 = arith.addf %29, %31 : vector<8x32xf32>
    %c0_25 = arith.constant 0 : index
    %c0_26 = arith.constant 0 : index
    %33 = vector.load %arg10[%c0_25, %c0_26] : memref<8x32xf32, #tpu.memory_space<vmem>>, vector<8x32xf32>
    tpu.vector_store %arg10[%c0_25, %c0_26], %32 {strides = array<i32>} : memref<8x32xf32, #tpu.memory_space<vmem>>, vector<8x32xf32>,
    return
  }
  func.func @transform_0(%arg0: i32) -> (i32, i32) {
    %c0_i32 = arith.constant 0 : i32
    %c0_i32_0 = arith.constant 0 : i32
    return %arg0, %c0_i32 : i32, i32
  }
  func.func @transform_1(%arg0: i32) -> (i32, i32) {
    %c0_i32 = arith.constant 0 : i32
    %c0_i32_0 = arith.constant 0 : i32
    %c0_i32_1 = arith.constant 0 : i32
    return %c0_i32, %c0_i32_0 : i32, i32
  }
  func.func @transform_2(%arg0: i32) -> (i32, i32) {
    %c0_i32 = arith.constant 0 : i32
    %c0_i32_0 = arith.constant 0 : i32
    %c0_i32_1 = arith.constant 0 : i32
    return %c0_i32, %c0_i32_0 : i32, i32
  }
  func.func @transform_3(%arg0: i32) -> (i32, i32) {
    %c0_i32 = arith.constant 0 : i32
    %c0_i32_0 = arith.constant 0 : i32
    %c0_i32_1 = arith.constant 0 : i32
    return %c0_i32, %c0_i32_0 : i32, i32
  }
  func.func @transform_4(%arg0: i32) -> (i32, i32) {
    %c0_i32 = arith.constant 0 : i32
    %c0_i32_0 = arith.constant 0 : i32
    %c0_i32_1 = arith.constant 0 : i32
    return %c0_i32, %c0_i32_0 : i32, i32
  }
  func.func @transform_5(%arg0: i32) -> (i32, i32) {
    %c0_i32 = arith.constant 0 : i32
    %c0_i32_0 = arith.constant 0 : i32
    %c0_i32_1 = arith.constant 0 : i32
    return %c0_i32, %c0_i32_0 : i32, i32
  }
  func.func @transform_6(%arg0: i32) -> (i32, i32) {
    %c0_i32 = arith.constant 0 : i32
    %c0_i32_0 = arith.constant 0 : i32
    %c0_i32_1 = arith.constant 0 : i32
    return %c0_i32, %c0_i32_0 : i32, i32
  }
  func.func @transform_7(%arg0: i32) -> (i32, i32) {
    %c0_i32 = arith.constant 0 : i32
    %c0_i32_0 = arith.constant 0 : i32
    %c0_i32_1 = arith.constant 0 : i32
    return %c0_i32, %c0_i32_0 : i32, i32
  }
  func.func @transform_8(%arg0: i32) -> (i32, i32) {
    %c0_i32 = arith.constant 0 : i32
    %c0_i32_0 = arith.constant 0 : i32
    %c0_i32_1 = arith.constant 0 : i32
    return %c0_i32, %c0_i32_0 : i32, i32
  }
  func.func @transform_9(%arg0: i32) -> (i32, i32) {
    %c0_i32 = arith.constant 0 : i32
    %c0_i32_0 = arith.constant 0 : i32
    return %arg0, %c0_i32 : i32, i32
  }
}

</mosaic_0001>

<bundles_post_ra>
// kernel: tpu_custom_call.1
= control target key start
LH: loop header
LB: loop body
LE: loop exit
PB: predicated region body
PF: predicated region fallthrough
CT: control target
= control target key end

     0   :  { %14 = vsyncpa [#allocation3], 0  ;;  %s3341_s0 = inlined_call_operand.hbm [shape: s32[8,16], index: 0, kind: input, shape index: {}]   ;;  %s3342_s1 = inlined_call_operand.vmem [shape: f32[16,512], index: 1, kind: input, shape index: {}]   ;;  %s3343_s2 = inlined_call_operand.vmem [shape: f32[1,512], index: 2, kind: input, shape index: {}]   ;;  %s3344_s3 = inlined_call_operand.vmem [shape: bf16[512,512], index: 3, kind: input, shape index: {}]   ;;  %s3345_s4 = inlined_call_operand.hbm [shape: f32[1,512], index: 4, kind: input, shape index: {}]   ;;  %s3346_s5 = inlined_call_operand.vmem [shape: f32[512,16], index: 5, kind: input, shape index: {}]   ;;  %s3347_s6 = inlined_call_operand.hbm [shape: f32[16,512], index: 6, kind: input, shape index: {}]   ;;  %s3348_s7 = inlined_call_operand.vmem [shape: f32[512,32], index: 7, kind: input, shape index: {}]   ;;  %s3349_s8 = inlined_call_operand.vmem [shape: f32[1,32], index: 8, kind: input, shape index: {}]   ;;  %s3350_s9 = inlined_call_operand.hbm [shape: f32[8,32], index: 9, kind: output, shape index: {}]  }
   0x1   :  { %15 = vsyncpa [#allocation6], 0 }
   0x2   :  { %16 = vsyncpa [#allocation4], 0  ;;  %s2399_s30 = smov [#allocation5]   ;;  %s2400_s11 = smov [#allocation2]  }
   0x3   :  { %s39_s10 = sshll.u32 %s2399_s30, 4  ;;  %s23_s12 = sshll.u32 %s2400_s11, 4  ;;  %s40_s10 = int_to_ptr.vmem [resolvable:$true] %s39_s10  ;;  %s24_s12 = int_to_ptr.vmem [resolvable:$true] %s23_s12 }
   0x4   :  { %s2321_s13 = scalar_lea.vmem %s40_s10, 64  ;;  %p2326_p1 = scmp.lt.s32.totalorder %s40_s10, %s40_s10 }
   0x5   :  { %p2322_p0 = scmp.ne.s32.totalorder %s40_s10, %s2321_s13  ;;  %p2327_p2 = scmp.lt.s32.totalorder %s2321_s13, %s2321_s13 }
   0x7   :  { %p2328_p3 = por %p2327_p2, %p2326_p1 }
   0x9   :  { %p2329_p4 = pnand %p2328_p3, %p2322_p0 }
   0xb   :  { %2332 = shalt.err (!%p2329_p4)
}
   0xc   :  { %42 = dma.hbm_to_vmem [thread:$0]  %s3345_s4, 64, %s40_s10, [#allocation6]  }
   0xd   :  { %s2341_s16 = scalar_lea.vmem %s24_s12, 128  ;;  %p2346_p6 = scmp.lt.s32.totalorder %s24_s12, %s24_s12 }
   0xe   :  { %p2342_p5 = scmp.ne.s32.totalorder %s24_s12, %s2341_s16  ;;  %p2347_p7 = scmp.lt.s32.totalorder %s2341_s16, %s2341_s16 }
  0x10   :  { %p2348_p8 = por %p2347_p7, %p2346_p6 }
  0x12   :  { %p2349_p9 = pnand %p2348_p8, %p2342_p5 }
  0x14   :  { %2352 = shalt.err (!%p2349_p9)
}
  0x15   :  { %26 = dma.hbm_to_vmem [thread:$0]  %s3341_s0, 128, %s24_s12, [#allocation3]  }
  0x16   :  { %s2401_s19 = smov [#allocation7]  }
  0x17   :  { %s50_s20 = sshll.u32 %s2401_s19, 4  ;;  %s51_s20 = int_to_ptr.vmem [resolvable:$true] %s50_s20 }
  0x18   :  { %s2361_s21 = scalar_lea.vmem %s51_s20, 1024  ;;  %p2366_p11 = scmp.lt.s32.totalorder %s51_s20, %s51_s20 }
  0x19   :  { %p2362_p10 = scmp.ne.s32.totalorder %s51_s20, %s2361_s21  ;;  %p2367_p12 = scmp.lt.s32.totalorder %s2361_s21, %s2361_s21 }
  0x1b   :  { %p2368_p13 = por %p2367_p12, %p2366_p11 }
  0x1d   :  { %p2369_p0 = pnand %p2368_p13, %p2362_p10 }
  0x1f   :  { %2372 = shalt.err (!%p2369_p0)
}
  0x20   :  { %s2402_s4 = smov 512   ;;  %s2403_s22 = smov 32  }
  0x21   :  { %56 = dma.hbm_to_vmem [thread:$0]  %s3347_s6, 1024, %s51_s20, [#allocation6], %s2402_s4, %s2402_s4, %s2403_s22  }
  0x22   :  { %2393 = dma.done.wait [#allocation3], 128  }
  0x23   :  { %2394 = vsyncadd [#allocation3], 4294967168 }
  0x24   :  { %2395 = dma.done.wait [#allocation6], 1088  }
  0x25   :  { %2396 = vsyncadd [#allocation6], 4294966208  ;;  %v2404_v0 = vmov 0.0   ;;  %v77_v1 = vld [vmem:[%s3342_s1 + $0x28] sm:$0xff]  ;;  %v79_v2 = vld [vmem:[%s3342_s1 + $0x38] sm:$0xff]  ;;  %vm80_vm0 = vcmask 130048  }
  0x26   :  { %148 = vmatprep.mubr.f32.mxu0 %v2404_v0  ;;  %219 = vmatprep.mubr.f32.mxu1 %v2404_v0  ;;  %v76_v3 = vld [vmem:[%s3342_s1 + $0x20] sm:$0xff]  ;;  %v78_v4 = vld [vmem:[%s3342_s1 + $0x30] sm:$0xff]  ;;  %v73_v5 = vld [vmem:[%s3342_s1 + $0x8] sm:$0xff]  ;;  %s2406_s25 = smov [#allocation8]   ;;  %vm1804_vm9 = vcmask 261120  }
  0x27   :  { %112 = vmatprep.subr.mxu0 %v77_v1  ;;  %183 = vmatprep.subr.mxu1 %v79_v2  ;;  %v75_v6 = vld [vmem:[%s3342_s1 + $0x18] sm:$0xff]  ;;  %v72_v7 = vld [vmem:[%s3342_s1] sm:$0xff]  ;;  %v74_v8 = vld [vmem:[%s3342_s1 + $0x10] sm:$0xff]  ;;  %s1812_s26 = sshll.u32 %s2406_s25, 4  ;;  %s1813_s26 = int_to_ptr.vmem [resolvable:$true] %s1812_s26 }
  0x28   :  { %113 = vmatpush1.msra.mxu0 %v76_v3  ;;  %184 = vmatpush1.msra.mxu1 %v78_v4  ;;  %v70_v9 = vld [vmem:[#allocation2] sm:$0xff]  ;;  %s2373_s27 = scalar_lea.vmem %s1813_s26, 128  ;;  %p2378_p2 = scmp.lt.s32.totalorder %s1813_s26, %s1813_s26 }
  0x29   :  { %114 = vmatprep.subr.mxu0 %v73_v5  ;;  %185 = vmatprep.subr.mxu1 %v75_v6  ;;  %v71_v10 = vcvt.s32.f32 %v70_v9  ;;  %v2119_v11 = vld [vmem:[%s3344_s3 + $0xe0] ss:$16 sps:$4 sm:$0xff]   ;;  %v2121_v12 = vld [vmem:[%s3344_s3 + $0xe4] ss:$16 sps:$4 sm:$0xff]   ;;  %p2374_p1 = scmp.ne.s32.totalorder %s1813_s26, %s2373_s27  ;;  %p2379_p3 = scmp.lt.s32.totalorder %s2373_s27, %s2373_s27 }
  0x2a   :  { %115 = vmatpush1.msra.mxu0 %v72_v7  ;;  %186 = vmatpush1.msra.mxu1 %v74_v8  ;;  %v2122_v13 = vld [vmem:[%s3344_s3 + $0x2e0] ss:$16 sps:$4 sm:$0xff]   ;;  %v2124_v14 = vld [vmem:[%s3344_s3 + $0x2e4] ss:$16 sps:$4 sm:$0xff]  }
  0x2b   :  { %1822 = vmatmul.mubr.msk.f32.vlgmr.msra.gmra.mxu0 %vm80_vm0, %v71_v10  ;;  %1823 = vmatmul.mubr.msk.f32.vlgmr.msra.gmra.mxu1 %vm80_vm0, %v71_v10  ;;  %v2125_v15 = vld [vmem:[%s3344_s3 + $0xc0] ss:$16 sps:$4 sm:$0xff]   ;;  %v2127_v16 = vld [vmem:[%s3344_s3 + $0xc4] ss:$16 sps:$4 sm:$0xff]   ;;  %p2380_p4 = por %p2379_p3, %p2378_p2 }
  0x2c   :  { %1036 = vmatprep.subr.bf16.mxu0 %v2121_v12  ;;  %1077 = vmatprep.subr.bf16.mxu1 %v2124_v14  ;;  %v2128_v17 = vld [vmem:[%s3344_s3 + $0x2c0] ss:$16 sps:$4 sm:$0xff]   ;;  %v2130_v18 = vld [vmem:[%s3344_s3 + $0x2c4] ss:$16 sps:$4 sm:$0xff]   ;;  %v2217_v12 = vld [vmem:[%s3344_s3 + $0xec] ss:$16 sps:$4 sm:$0xff]   ;;  %v228_v14 = vlaneseq }
  0x2d   :  { %1037 = vmatpush1.bf16.msra.mxu0 %v2119_v11  ;;  %1078 = vmatpush1.bf16.msra.mxu1 %v2122_v13  ;;  %v2133_v19 = vld [vmem:[%s3344_s3 + $0xa4] ss:$16 sps:$4 sm:$0xff]   ;;  %v2131_v20 = vld [vmem:[%s3344_s3 + $0xa0] ss:$16 sps:$4 sm:$0xff]   ;;  %v2220_v13 = vld [vmem:[%s3344_s3 + $0x2ec] ss:$16 sps:$4 sm:$0xff]   ;;  %p2381_p5 = pnand %p2380_p4, %p2374_p1 }
  0x2e   :  { %1038 = vmatprep.subr.bf16.mxu0 %v2127_v16  ;;  %1079 = vmatprep.subr.bf16.mxu1 %v2130_v18  ;;  %v2136_v21 = vld [vmem:[%s3344_s3 + $0x2a4] ss:$16 sps:$4 sm:$0xff]   ;;  %v2134_v22 = vld [vmem:[%s3344_s3 + $0x2a0] ss:$16 sps:$4 sm:$0xff]  }
  0x2f   :  { %v2139_v23 = vld [vmem:[%s3344_s3 + $0x84] ss:$16 sps:$4 sm:$0xff]   ;;  %v2137_v25 = vld [vmem:[%s3344_s3 + $0x80] ss:$16 sps:$4 sm:$0xff]  }
  0x30   :  { %v2142_v24 = vld [vmem:[%s3344_s3 + $0x284] ss:$16 sps:$4 sm:$0xff]   ;;  %v2140_v26 = vld [vmem:[%s3344_s3 + $0x280] ss:$16 sps:$4 sm:$0xff]  }
  0x31   :  { %1039 = vmatpush1.bf16.msra.mxu0 %v2125_v15  ;;  %1080 = vmatpush1.bf16.msra.mxu1 %v2128_v17  ;;  %v2145_v27 = vld [vmem:[%s3344_s3 + $0x64] ss:$16 sps:$4 sm:$0xff]   ;;  %v2143_v29 = vld [vmem:[%s3344_s3 + $0x60] ss:$16 sps:$4 sm:$0xff]   ;;  %v2692_v15 = vshrl.u32 %v228_v14, 7 }
  0x32   :  { %1040 = vmatprep.subr.bf16.mxu0 %v2133_v19  ;;  %1081 = vmatprep.subr.bf16.mxu1 %v2136_v21  ;;  %v2148_v28 = vld [vmem:[%s3344_s3 + $0x264] ss:$16 sps:$4 sm:$0xff]   ;;  %v2146_v30 = vld [vmem:[%s3344_s3 + $0x260] ss:$16 sps:$4 sm:$0xff]   ;;  %v2272_v14 = vld [vmem:[%s3344_s3 + $0x3c8] ss:$16 sps:$4 sm:$0xff]  }
  0x33   :  { %v2151_v31 = vld [vmem:[%s3344_s3 + $0x44] ss:$16 sps:$4 sm:$0xff]   ;;  %v2149_v33 = vld [vmem:[%s3344_s3 + $0x40] ss:$16 sps:$4 sm:$0xff]   ;;  %v230_v16 = vsub.s32 0, %v2692_v15  ;;  %v238_v17 = vsub.s32 2, %v2692_v15 }
  0x34   :  { %v2154_v32 = vld [vmem:[%s3344_s3 + $0x244] ss:$16 sps:$4 sm:$0xff]   ;;  %v2152_v34 = vld [vmem:[%s3344_s3 + $0x240] ss:$16 sps:$4 sm:$0xff]   ;;  %v234_v19 = vsub.s32 1, %v2692_v15 }
  0x35   :  { %1041 = vmatpush1.bf16.msra.mxu0 %v2131_v20  ;;  %1082 = vmatpush1.bf16.msra.mxu1 %v2134_v22  ;;  %v2157_v35 = vld [vmem:[%s3344_s3 + $0x24] ss:$16 sps:$4 sm:$0xff]   ;;  %v2155_v37 = vld [vmem:[%s3344_s3 + $0x20] ss:$16 sps:$4 sm:$0xff]   ;;  %v242_v20 = vsub.s32 3, %v2692_v15 }
  0x36   :  { %1042 = vmatprep.subr.bf16.mxu0 %v2139_v23  ;;  %1083 = vmatprep.subr.bf16.mxu1 %v2142_v24  ;;  %v2160_v36 = vld [vmem:[%s3344_s3 + $0x224] ss:$16 sps:$4 sm:$0xff]   ;;  %v2158_v38 = vld [vmem:[%s3344_s3 + $0x220] ss:$16 sps:$4 sm:$0xff]  }
  0x37   :  { %v2163_v39 = vld [vmem:[%s3344_s3 + $0x4] ss:$16 sps:$4 sm:$0xff]   ;;  %v2161_v41 = vld [vmem:[%s3344_s3] ss:$16 sps:$4 sm:$0xff]  }
  0x38   :  { %v2166_v40 = vld [vmem:[%s3344_s3 + $0x204] ss:$16 sps:$4 sm:$0xff]   ;;  %v2164_v42 = vld [vmem:[%s3344_s3 + $0x200] ss:$16 sps:$4 sm:$0xff]  }
  0x39   :  { %1043 = vmatpush1.bf16.msra.mxu0 %v2137_v25  ;;  %1084 = vmatpush1.bf16.msra.mxu1 %v2140_v26  ;;  %v2169_v43 = vld [vmem:[%s3344_s3 + $0x1e4] ss:$16 sps:$4 sm:$0xff]   ;;  %v2167_v45 = vld [vmem:[%s3344_s3 + $0x1e0] ss:$16 sps:$4 sm:$0xff]  }
  0x3a   :  { %1044 = vmatprep.subr.bf16.mxu0 %v2145_v27  ;;  %1085 = vmatprep.subr.bf16.mxu1 %v2148_v28  ;;  %v2172_v44 = vld [vmem:[%s3344_s3 + $0x3e4] ss:$16 sps:$4 sm:$0xff]   ;;  %v2170_v46 = vld [vmem:[%s3344_s3 + $0x3e0] ss:$16 sps:$4 sm:$0xff]  }
  0x3b   :  { %v2175_v47 = vld [vmem:[%s3344_s3 + $0x1c4] ss:$16 sps:$4 sm:$0xff]   ;;  %v2173_v49 = vld [vmem:[%s3344_s3 + $0x1c0] ss:$16 sps:$4 sm:$0xff]  }
  0x3c   :  { %v2178_v48 = vld [vmem:[%s3344_s3 + $0x3c4] ss:$16 sps:$4 sm:$0xff]   ;;  %v2176_v50 = vld [vmem:[%s3344_s3 + $0x3c0] ss:$16 sps:$4 sm:$0xff]  }
  0x3d   :  { %1045 = vmatpush1.bf16.msra.mxu0 %v2143_v29  ;;  %1086 = vmatpush1.bf16.msra.mxu1 %v2146_v30  ;;  %v2181_v51 = vld [vmem:[%s3344_s3 + $0x1a4] ss:$16 sps:$4 sm:$0xff]   ;;  %v2179_v53 = vld [vmem:[%s3344_s3 + $0x1a0] ss:$16 sps:$4 sm:$0xff]  }
  0x3e   :  { %1046 = vmatprep.subr.bf16.mxu0 %v2151_v31  ;;  %1087 = vmatprep.subr.bf16.mxu1 %v2154_v32  ;;  %v2184_v52 = vld [vmem:[%s3344_s3 + $0x3a4] ss:$16 sps:$4 sm:$0xff]   ;;  %v2182_v54 = vld [vmem:[%s3344_s3 + $0x3a0] ss:$16 sps:$4 sm:$0xff]  }
  0x3f   :  { %v2187_v55 = vld [vmem:[%s3344_s3 + $0x184] ss:$16 sps:$4 sm:$0xff]   ;;  %v2185_v57 = vld [vmem:[%s3344_s3 + $0x180] ss:$16 sps:$4 sm:$0xff]  }
  0x40   :  { %v2190_v56 = vld [vmem:[%s3344_s3 + $0x384] ss:$16 sps:$4 sm:$0xff]   ;;  %v2188_v58 = vld [vmem:[%s3344_s3 + $0x380] ss:$16 sps:$4 sm:$0xff]  }
  0x41   :  { %1047 = vmatpush1.bf16.msra.mxu0 %v2149_v33  ;;  %1088 = vmatpush1.bf16.msra.mxu1 %v2152_v34  ;;  %v2193_v59 = vld [vmem:[%s3344_s3 + $0x164] ss:$16 sps:$4 sm:$0xff]   ;;  %v2191_v61 = vld [vmem:[%s3344_s3 + $0x160] ss:$16 sps:$4 sm:$0xff]  }
  0x42   :  { %1048 = vmatprep.subr.bf16.mxu0 %v2157_v35  ;;  %1089 = vmatprep.subr.bf16.mxu1 %v2160_v36  ;;  %v2196_v60 = vld [vmem:[%s3344_s3 + $0x364] ss:$16 sps:$4 sm:$0xff]   ;;  %v2194_v62 = vld [vmem:[%s3344_s3 + $0x360] ss:$16 sps:$4 sm:$0xff]  }
  0x43   :  { %v2199_v63 = vld [vmem:[%s3344_s3 + $0x144] ss:$16 sps:$4 sm:$0xff]   ;;  %v2197_v2 = vld [vmem:[%s3344_s3 + $0x140] ss:$16 sps:$4 sm:$0xff]  }
  0x44   :  { %v2202_v1 = vld [vmem:[%s3344_s3 + $0x344] ss:$16 sps:$4 sm:$0xff]   ;;  %v2200_v3 = vld [vmem:[%s3344_s3 + $0x340] ss:$16 sps:$4 sm:$0xff]  }
  0x45   :  { %1049 = vmatpush1.bf16.msra.mxu0 %v2155_v37  ;;  %1090 = vmatpush1.bf16.msra.mxu1 %v2158_v38  ;;  %v2205_v4 = vld [vmem:[%s3344_s3 + $0x124] ss:$16 sps:$4 sm:$0xff]   ;;  %v2203_v6 = vld [vmem:[%s3344_s3 + $0x120] ss:$16 sps:$4 sm:$0xff]   ;;  %v2215_v38 = vld [vmem:[%s3344_s3 + $0xe8] ss:$16 sps:$4 sm:$0xff]  }
  0x46   :  { %1050 = vmatprep.subr.bf16.mxu0 %v2163_v39  ;;  %1091 = vmatprep.subr.bf16.mxu1 %v2166_v40  ;;  %v2208_v5 = vld [vmem:[%s3344_s3 + $0x324] ss:$16 sps:$4 sm:$0xff]   ;;  %v2206_v7 = vld [vmem:[%s3344_s3 + $0x320] ss:$16 sps:$4 sm:$0xff]   ;;  %v2218_v39 = vld [vmem:[%s3344_s3 + $0x2e8] ss:$16 sps:$4 sm:$0xff]  }
  0x47   :  { %v2211_v8 = vld [vmem:[%s3344_s3 + $0x104] ss:$16 sps:$4 sm:$0xff]   ;;  %v2209_v10 = vld [vmem:[%s3344_s3 + $0x100] ss:$16 sps:$4 sm:$0xff]   ;;  %v2405_v40 = vmov 1.0|1.0  }
  0x48   :  { %v2214_v9 = vld [vmem:[%s3344_s3 + $0x304] ss:$16 sps:$4 sm:$0xff]   ;;  %v2212_v11 = vld [vmem:[%s3344_s3 + $0x300] ss:$16 sps:$4 sm:$0xff]  }
  0x49   :  { %1051 = vmatpush1.bf16.msra.mxu0 %v2161_v41  ;;  %1092 = vmatpush1.bf16.msra.mxu1 %v2164_v42  ;;  %v226_v18 = vld [vmem:[%s3343_s2] sm:$0xf]  ;;  %v2223_v41 = vld [vmem:[%s3344_s3 + $0xcc] ss:$16 sps:$4 sm:$0xff]   ;;  %v1441_v15 = vld [vmem:[#allocation7 + $0x28] sm:$0xff] }
  0x4a   :  { %1052 = vmatprep.subr.bf16.mxu0 %v2169_v43  ;;  %1093 = vmatprep.subr.bf16.mxu1 %v2172_v44  ;;  %v231_v21 = vrot.slane %v226_v18, %v230_v16  ;;  %v239_v22 = vrot.slane %v226_v18, %v238_v17  ;;  %v235_v23 = vrot.slane %v226_v18, %v234_v19  ;;  %v2226_v43 = vld [vmem:[%s3344_s3 + $0x2cc] ss:$16 sps:$4 sm:$0xff]   ;;  %v2221_v44 = vld [vmem:[%s3344_s3 + $0xc8] ss:$16 sps:$4 sm:$0xff]   ;;  %v1258_v37 = vld [vmem:[%s3346_s5 + $0xe0] sm:$0xff] }
  0x4b   :  { %v243_v24 = vrot.slane %v226_v18, %v242_v20  ;;  %v2277_v18 = vld [vmem:[%s3344_s3 + $0x1ac] ss:$16 sps:$4 sm:$0xff]  }
  0x4c   :  { %v1257_v42 = vld [vmem:[%s3346_s5 + $0xd8] sm:$0xff] }
  0x4d   :  { %1053 = vmatpush2.bf16.msra.mxu0 %v2167_v45  ;;  %1094 = vmatpush2.bf16.msra.mxu1 %v2170_v46  ;;  %v2224_v45 = vld [vmem:[%s3344_s3 + $0x2c8] ss:$16 sps:$4 sm:$0xff]   ;;  %v2229_v46 = vld [vmem:[%s3344_s3 + $0xac] ss:$16 sps:$4 sm:$0xff]  }
  0x4e   :  { %1054 = vmatprep.subr.bf16.mxu0 %v2175_v47  ;;  %1095 = vmatprep.subr.bf16.mxu1 %v2178_v48  ;;  %v2232_v47 = vld [vmem:[%s3344_s3 + $0x2ac] ss:$16 sps:$4 sm:$0xff]   ;;  %v2227_v48 = vld [vmem:[%s3344_s3 + $0xa8] ss:$16 sps:$4 sm:$0xff]  }
  0x51   :  { %1055 = vmatpush2.bf16.msra.mxu0 %v2173_v49  ;;  %1096 = vmatpush2.bf16.msra.mxu1 %v2176_v50  ;;  %v2230_v49 = vld [vmem:[%s3344_s3 + $0x2a8] ss:$16 sps:$4 sm:$0xff]   ;;  %v2235_v50 = vld [vmem:[%s3344_s3 + $0x8c] ss:$16 sps:$4 sm:$0xff]  }
  0x52   :  { %1056 = vmatprep.subr.bf16.mxu0 %v2181_v51  ;;  %1097 = vmatprep.subr.bf16.mxu1 %v2184_v52  ;;  %v2238_v51 = vld [vmem:[%s3344_s3 + $0x28c] ss:$16 sps:$4 sm:$0xff]   ;;  %v2233_v52 = vld [vmem:[%s3344_s3 + $0x88] ss:$16 sps:$4 sm:$0xff]  }
  0x55   :  { %1057 = vmatpush2.bf16.msra.mxu0 %v2179_v53  ;;  %1098 = vmatpush2.bf16.msra.mxu1 %v2182_v54  ;;  %v2236_v53 = vld [vmem:[%s3344_s3 + $0x288] ss:$16 sps:$4 sm:$0xff]   ;;  %v2241_v54 = vld [vmem:[%s3344_s3 + $0x6c] ss:$16 sps:$4 sm:$0xff]  }
  0x56   :  { %1058 = vmatprep.subr.bf16.mxu0 %v2187_v55  ;;  %1099 = vmatprep.subr.bf16.mxu1 %v2190_v56  ;;  %v2244_v55 = vld [vmem:[%s3344_s3 + $0x26c] ss:$16 sps:$4 sm:$0xff]   ;;  %v2239_v56 = vld [vmem:[%s3344_s3 + $0x68] ss:$16 sps:$4 sm:$0xff]  }
  0x59   :  { %1059 = vmatpush2.bf16.msra.mxu0 %v2185_v57  ;;  %1100 = vmatpush2.bf16.msra.mxu1 %v2188_v58  ;;  %v2242_v57 = vld [vmem:[%s3344_s3 + $0x268] ss:$16 sps:$4 sm:$0xff]   ;;  %v2247_v58 = vld [vmem:[%s3344_s3 + $0x4c] ss:$16 sps:$4 sm:$0xff]  }
  0x5a   :  { %1060 = vmatprep.subr.bf16.mxu0 %v2193_v59  ;;  %1101 = vmatprep.subr.bf16.mxu1 %v2196_v60  ;;  %v2250_v59 = vld [vmem:[%s3344_s3 + $0x24c] ss:$16 sps:$4 sm:$0xff]   ;;  %v2245_v60 = vld [vmem:[%s3344_s3 + $0x48] ss:$16 sps:$4 sm:$0xff]  }
  0x5d   :  { %1061 = vmatpush2.bf16.msra.mxu0 %v2191_v61  ;;  %1102 = vmatpush2.bf16.msra.mxu1 %v2194_v62  ;;  %v2248_v61 = vld [vmem:[%s3344_s3 + $0x248] ss:$16 sps:$4 sm:$0xff]   ;;  %v2253_v62 = vld [vmem:[%s3344_s3 + $0x2c] ss:$16 sps:$4 sm:$0xff]  }
  0x5e   :  { %1062 = vmatprep.subr.bf16.mxu0 %v2199_v63  ;;  %1103 = vmatprep.subr.bf16.mxu1 %v2202_v1  ;;  %v2256_v63 = vld [vmem:[%s3344_s3 + $0x22c] ss:$16 sps:$4 sm:$0xff]   ;;  %v2251_v1 = vld [vmem:[%s3344_s3 + $0x28] ss:$16 sps:$4 sm:$0xff]  }
  0x61   :  { %1063 = vmatpush2.bf16.msra.mxu0 %v2197_v2  ;;  %1104 = vmatpush2.bf16.msra.mxu1 %v2200_v3  ;;  %v2254_v2 = vld [vmem:[%s3344_s3 + $0x228] ss:$16 sps:$4 sm:$0xff]   ;;  %v2259_v3 = vld [vmem:[%s3344_s3 + $0xc] ss:$16 sps:$4 sm:$0xff]  }
  0x62   :  { %1064 = vmatprep.subr.bf16.mxu0 %v2205_v4  ;;  %1105 = vmatprep.subr.bf16.mxu1 %v2208_v5  ;;  %v2262_v4 = vld [vmem:[%s3344_s3 + $0x20c] ss:$16 sps:$4 sm:$0xff]   ;;  %v2257_v5 = vld [vmem:[%s3344_s3 + $0x8] ss:$16 sps:$4 sm:$0xff]  }
  0x65   :  { %1065 = vmatpush2.bf16.msra.mxu0 %v2203_v6  ;;  %1106 = vmatpush2.bf16.msra.mxu1 %v2206_v7  ;;  %v2260_v6 = vld [vmem:[%s3344_s3 + $0x208] ss:$16 sps:$4 sm:$0xff]   ;;  %v2265_v7 = vld [vmem:[%s3344_s3 + $0x1ec] ss:$16 sps:$4 sm:$0xff]  }
  0x66   :  { %1066 = vmatprep.subr.bf16.mxu0 %v2211_v8  ;;  %1107 = vmatprep.subr.bf16.mxu1 %v2214_v9  ;;  %v2268_v8 = vld [vmem:[%s3344_s3 + $0x3ec] ss:$16 sps:$4 sm:$0xff]   ;;  %v2263_v9 = vld [vmem:[%s3344_s3 + $0x1e8] ss:$16 sps:$4 sm:$0xff]  }
  0x69   :  { %1067 = vmatpush2.bf16.msra.mxu0 %v2209_v10  ;;  %1108 = vmatpush2.bf16.msra.mxu1 %v2212_v11  ;;  %v2266_v10 = vld [vmem:[%s3344_s3 + $0x3e8] ss:$16 sps:$4 sm:$0xff]   ;;  %v2271_v11 = vld [vmem:[%s3344_s3 + $0x1cc] ss:$16 sps:$4 sm:$0xff]  }
  0x6a   :  { %1118 = vmatprep.subr.bf16.mxu0 %v2217_v12  ;;  %1159 = vmatprep.subr.bf16.mxu1 %v2220_v13  ;;  %v2274_v12 = vld [vmem:[%s3344_s3 + $0x3cc] ss:$16 sps:$4 sm:$0xff]   ;;  %v2269_v13 = vld [vmem:[%s3344_s3 + $0x1c8] ss:$16 sps:$4 sm:$0xff]  }
  0xeb   :  { %v150_v25 = vpop.f32.mrf.mxu0  ;;  %v221_v26 = vpop.f32.mrf.mxu1 }
  0xec   :  { %v248_v27 = vsub.f32 %v150_v25, %v231_v21  ;;  %v250_v28 = vsub.f32 %v221_v26, %v239_v22  ;;  %v2280_v21 = vld [vmem:[%s3344_s3 + $0x3ac] ss:$16 sps:$4 sm:$0xff]   ;;  %v2275_v22 = vld [vmem:[%s3344_s3 + $0x1a8] ss:$16 sps:$4 sm:$0xff]  }
  0xed   :  { %v152_v29 = vpop.f32.mrf.mxu0  ;;  %v223_v30 = vpop.f32.mrf.mxu1  ;;  %v2286_v25 = vld [vmem:[%s3344_s3 + $0x38c] ss:$16 sps:$4 sm:$0xff]   ;;  %v2281_v26 = vld [vmem:[%s3344_s3 + $0x188] ss:$16 sps:$4 sm:$0xff]  }
  0xee   :  { %v252_v31 = vand.u32 2147483647, %v248_v27  ;;  %v254_v32 = vand.u32 2147483647, %v250_v28  ;;  %v249_v33 = vsub.f32 %v152_v29, %v235_v23  ;;  %v251_v34 = vsub.f32 %v223_v30, %v243_v24  ;;  %v2278_v23 = vld [vmem:[%s3344_s3 + $0x3a8] ss:$16 sps:$4 sm:$0xff]  }
  0xef   :  { %v2283_v24 = vld [vmem:[%s3344_s3 + $0x18c] ss:$16 sps:$4 sm:$0xff]   ;;  %v2284_v27 = vld [vmem:[%s3344_s3 + $0x388] ss:$16 sps:$4 sm:$0xff]  }
  0xf0   :  { %vm256_vm1 = vcmp.lt.f32.partialorder %v252_v31, 0.5  ;;  %v253_v35 = vand.u32 2147483647, %v249_v33  ;;  %v255_v36 = vand.u32 2147483647, %v251_v34  ;;  %vm258_vm3 = vcmp.lt.f32.partialorder %v254_v32, 0.5 }
  0xf1   :  { %vm2709_vm2 = vmpackc.low %vm256_vm1, %vm256_vm1  ;;  %v2289_v28 = vld [vmem:[%s3344_s3 + $0x16c] ss:$16 sps:$4 sm:$0xff]   ;;  %v2287_v30 = vld [vmem:[%s3344_s3 + $0x168] ss:$16 sps:$4 sm:$0xff]  }
  0xf2   :  { %vm257_vm4 = vcmp.lt.f32.partialorder %v253_v35, 0.5  ;;  %vm259_vm5 = vcmp.lt.f32.partialorder %v255_v36, 0.5  ;;  %vm2723_vm8 = vmpackc.low %vm258_vm3, %vm258_vm3  ;;  %v2292_v29 = vld [vmem:[%s3344_s3 + $0x36c] ss:$16 sps:$4 sm:$0xff]   ;;  %v2290_v31 = vld [vmem:[%s3344_s3 + $0x368] ss:$16 sps:$4 sm:$0xff]  }
  0xf3   :  { %vm1952_vm6 = vmpackc.low %vm257_vm4, %vm257_vm4  ;;  %v2295_v32 = vld [vmem:[%s3344_s3 + $0x14c] ss:$16 sps:$4 sm:$0xff]   ;;  %v2293_v34 = vld [vmem:[%s3344_s3 + $0x148] ss:$16 sps:$4 sm:$0xff]  }
  0xf4   :  { %vm1956_vm7 = vmpackc.low %vm259_vm5, %vm259_vm5  ;;  %1953 = vmatprep.mubr.msk.bf16.mxu0 %vm1952_vm6, %v2405_v40  ;;  %v2298_v33 = vld [vmem:[%s3344_s3 + $0x34c] ss:$16 sps:$4 sm:$0xff]   ;;  %v2296_v35 = vld [vmem:[%s3344_s3 + $0x348] ss:$16 sps:$4 sm:$0xff]  }
  0xf5   :  { %1957 = vmatprep.mubr.msk.bf16.mxu1 %vm1956_vm7, %v2405_v40  ;;  %1955 = vmatmul.mubr.msk.bf16.vlgmr.msra.gmra.mxu0 %vm2709_vm2, %v2405_v40  ;;  %v2301_v36 = vld [vmem:[%s3344_s3 + $0x12c] ss:$16 sps:$4 sm:$0xff]  }
  0xf6   :  { %1959 = vmatmul.mubr.msk.bf16.vlgmr.msra.gmra.mxu1 %vm2723_vm8, %v2405_v40  ;;  %1119 = vmatpush1.bf16.msra.mxu0 %v2215_v38  ;;  %v2304_v38 = vld [vmem:[%s3344_s3 + $0x32c] ss:$16 sps:$4 sm:$0xff]  }
  0xf7   :  { %1160 = vmatpush1.bf16.msra.mxu1 %v2218_v39  ;;  %1961 = vmatprep.mubr.msk.bf16.mxu0 %vm1952_vm6, %v2405_v40  ;;  %v2299_v39 = vld [vmem:[%s3344_s3 + $0x128] ss:$16 sps:$4 sm:$0xff]  }
  0xf8   :  { %1965 = vmatprep.mubr.msk.bf16.mxu1 %vm1956_vm7, %v2405_v40  ;;  %1120 = vmatprep.subr.bf16.mxu0 %v2223_v41  ;;  %v2302_v41 = vld [vmem:[%s3344_s3 + $0x328] ss:$16 sps:$4 sm:$0xff]  }
  0xf9   :  { %1161 = vmatprep.subr.bf16.mxu1 %v2226_v43  ;;  %v2307_v43 = vld [vmem:[%s3344_s3 + $0x10c] ss:$16 sps:$4 sm:$0xff]  }
  0xfa   :  { %1121 = vmatpush1.bf16.msra.mxu0 %v2221_v44  ;;  %v2310_v44 = vld [vmem:[%s3344_s3 + $0x30c] ss:$16 sps:$4 sm:$0xff]  }
  0xfb   :  { %1162 = vmatpush1.bf16.msra.mxu1 %v2224_v45  ;;  %1122 = vmatprep.subr.bf16.mxu0 %v2229_v46  ;;  %v2305_v45 = vld [vmem:[%s3344_s3 + $0x108] ss:$16 sps:$4 sm:$0xff]  }
  0xfc   :  { %1163 = vmatprep.subr.bf16.mxu1 %v2232_v47  ;;  %v2308_v46 = vld [vmem:[%s3344_s3 + $0x308] ss:$16 sps:$4 sm:$0xff]  }
  0xfd   :  { %v1261_v47 = vld [vmem:[%s3346_s5 + $0xf8] sm:$0xff] }
  0xfe   :  { %1123 = vmatpush1.bf16.msra.mxu0 %v2227_v48  ;;  %v1245_v48 = vld [vmem:[%s3346_s5 + $0x78] sm:$0xff] }
  0xff   :  { %1164 = vmatpush1.bf16.msra.mxu1 %v2230_v49  ;;  %1124 = vmatprep.subr.bf16.mxu0 %v2235_v50  ;;  %v1260_v49 = vld [vmem:[%s3346_s5 + $0xf0] sm:$0xff] }
 0x100   :  { %1165 = vmatprep.subr.bf16.mxu1 %v2238_v51  ;;  %v1244_v50 = vld [vmem:[%s3346_s5 + $0x70] sm:$0xff]  ;;  %v1259_v51 = vld [vmem:[%s3346_s5 + $0xe8] sm:$0xff] }
 0x102   :  { %1125 = vmatpush1.bf16.msra.mxu0 %v2233_v52  ;;  %v1243_v52 = vld [vmem:[%s3346_s5 + $0x68] sm:$0xff] }
 0x103   :  { %1166 = vmatpush1.bf16.msra.mxu1 %v2236_v53  ;;  %1126 = vmatprep.subr.bf16.mxu0 %v2241_v54  ;;  %v1241_v53 = vld [vmem:[%s3346_s5 + $0x58] sm:$0xff]  ;;  %v1256_v54 = vld [vmem:[%s3346_s5 + $0xd0] sm:$0xff] }
 0x104   :  { %1167 = vmatprep.subr.bf16.mxu1 %v2244_v55  ;;  %v1240_v55 = vld [vmem:[%s3346_s5 + $0x50] sm:$0xff] }
 0x106   :  { %1127 = vmatpush1.bf16.msra.mxu0 %v2239_v56  ;;  %v1255_v56 = vld [vmem:[%s3346_s5 + $0xc8] sm:$0xff] }
 0x107   :  { %1168 = vmatpush1.bf16.msra.mxu1 %v2242_v57  ;;  %1128 = vmatprep.subr.bf16.mxu0 %v2247_v58  ;;  %v1239_v57 = vld [vmem:[%s3346_s5 + $0x48] sm:$0xff]  ;;  %v1254_v58 = vld [vmem:[%s3346_s5 + $0xc0] sm:$0xff] }
 0x108   :  { %1169 = vmatprep.subr.bf16.mxu1 %v2250_v59  ;;  %v1293_v59 = vld [vmem:[%s3346_s5 + $0x1f8] sm:$0xff] }
 0x10a   :  { %1129 = vmatpush1.bf16.msra.mxu0 %v2245_v60  ;;  %v1277_v60 = vld [vmem:[%s3346_s5 + $0x178] sm:$0xff] }
 0x10b   :  { %1170 = vmatpush1.bf16.msra.mxu1 %v2248_v61  ;;  %1130 = vmatprep.subr.bf16.mxu0 %v2253_v62  ;;  %v1292_v61 = vld [vmem:[%s3346_s5 + $0x1f0] sm:$0xff]  ;;  %v1238_v62 = vld [vmem:[%s3346_s5 + $0x40] sm:$0xff] }
 0x10c   :  { %1171 = vmatprep.subr.bf16.mxu1 %v2256_v63  ;;  %v1276_v63 = vld [vmem:[%s3346_s5 + $0x170] sm:$0xff] }
 0x10e   :  { %1131 = vmatpush1.bf16.msra.mxu0 %v2251_v1  ;;  %v1253_v1 = vld [vmem:[%s3346_s5 + $0xb8] sm:$0xff] }
 0x10f   :  { %1172 = vmatpush1.bf16.msra.mxu1 %v2254_v2  ;;  %1132 = vmatprep.subr.bf16.mxu0 %v2259_v3  ;;  %v1291_v2 = vld [vmem:[%s3346_s5 + $0x1e8] sm:$0xff]  ;;  %v1237_v3 = vld [vmem:[%s3346_s5 + $0x38] sm:$0xff] }
 0x110   :  { %1173 = vmatprep.subr.bf16.mxu1 %v2262_v4  ;;  %v1275_v4 = vld [vmem:[%s3346_s5 + $0x168] sm:$0xff] }
 0x112   :  { %1133 = vmatpush1.bf16.msra.mxu0 %v2257_v5  ;;  %v1252_v5 = vld [vmem:[%s3346_s5 + $0xb0] sm:$0xff] }
 0x113   :  { %1174 = vmatpush1.bf16.msra.mxu1 %v2260_v6  ;;  %1134 = vmatprep.subr.bf16.mxu0 %v2265_v7  ;;  %v1290_v6 = vld [vmem:[%s3346_s5 + $0x1e0] sm:$0xff]  ;;  %v1236_v7 = vld [vmem:[%s3346_s5 + $0x30] sm:$0xff] }
 0x114   :  { %1175 = vmatprep.subr.bf16.mxu1 %v2268_v8  ;;  %v1274_v8 = vld [vmem:[%s3346_s5 + $0x160] sm:$0xff] }
 0x116   :  { %1135 = vmatpush2.bf16.msra.mxu0 %v2263_v9  ;;  %v1251_v9 = vld [vmem:[%s3346_s5 + $0xa8] sm:$0xff] }
 0x117   :  { %1176 = vmatpush2.bf16.msra.mxu1 %v2266_v10  ;;  %1136 = vmatprep.subr.bf16.mxu0 %v2271_v11  ;;  %v1289_v10 = vld [vmem:[%s3346_s5 + $0x1d8] sm:$0xff]  ;;  %v1235_v11 = vld [vmem:[%s3346_s5 + $0x28] sm:$0xff] }
 0x118   :  { %1177 = vmatprep.subr.bf16.mxu1 %v2274_v12  ;;  %v1273_v12 = vld [vmem:[%s3346_s5 + $0x158] sm:$0xff] }
 0x11a   :  { %1137 = vmatpush2.bf16.msra.mxu0 %v2269_v13  ;;  %v1250_v13 = vld [vmem:[%s3346_s5 + $0xa0] sm:$0xff] }
 0x11b   :  { %1178 = vmatpush2.bf16.msra.mxu1 %v2272_v14  ;;  %1138 = vmatprep.subr.bf16.mxu0 %v2277_v18  ;;  %v1288_v14 = vld [vmem:[%s3346_s5 + $0x1d0] sm:$0xff]  ;;  %v1234_v18 = vld [vmem:[%s3346_s5 + $0x20] sm:$0xff] }
 0x11c   :  { %1179 = vmatprep.subr.bf16.mxu1 %v2280_v21  ;;  %v1272_v21 = vld [vmem:[%s3346_s5 + $0x150] sm:$0xff] }
 0x11e   :  { %1139 = vmatpush2.bf16.msra.mxu0 %v2275_v22  ;;  %v1249_v22 = vld [vmem:[%s3346_s5 + $0x98] sm:$0xff] }
 0x11f   :  { %1180 = vmatpush2.bf16.msra.mxu1 %v2278_v23  ;;  %1140 = vmatprep.subr.bf16.mxu0 %v2283_v24  ;;  %v1287_v23 = vld [vmem:[%s3346_s5 + $0x1c8] sm:$0xff]  ;;  %v1233_v24 = vld [vmem:[%s3346_s5 + $0x18] sm:$0xff] }
 0x120   :  { %1181 = vmatprep.subr.bf16.mxu1 %v2286_v25  ;;  %v1271_v25 = vld [vmem:[%s3346_s5 + $0x148] sm:$0xff] }
 0x122   :  { %1141 = vmatpush2.bf16.msra.mxu0 %v2281_v26  ;;  %v1248_v26 = vld [vmem:[%s3346_s5 + $0x90] sm:$0xff] }
 0x123   :  { %1182 = vmatpush2.bf16.msra.mxu1 %v2284_v27  ;;  %1142 = vmatprep.subr.bf16.mxu0 %v2289_v28  ;;  %v1286_v27 = vld [vmem:[%s3346_s5 + $0x1c0] sm:$0xff]  ;;  %v1232_v28 = vld [vmem:[%s3346_s5 + $0x10] sm:$0xff] }
 0x124   :  { %1183 = vmatprep.subr.bf16.mxu1 %v2292_v29  ;;  %v1270_v29 = vld [vmem:[%s3346_s5 + $0x140] sm:$0xff] }
 0x126   :  { %1143 = vmatpush2.bf16.msra.mxu0 %v2287_v30  ;;  %v1247_v30 = vld [vmem:[%s3346_s5 + $0x88] sm:$0xff] }
 0x127   :  { %1184 = vmatpush2.bf16.msra.mxu1 %v2290_v31  ;;  %1144 = vmatprep.subr.bf16.mxu0 %v2295_v32  ;;  %v1285_v31 = vld [vmem:[%s3346_s5 + $0x1b8] sm:$0xff]  ;;  %v1231_v32 = vld [vmem:[%s3346_s5 + $0x8] sm:$0xff] }
 0x128   :  { %1185 = vmatprep.subr.bf16.mxu1 %v2298_v33  ;;  %v1269_v33 = vld [vmem:[%s3346_s5 + $0x138] sm:$0xff] }
 0x12a   :  { %1145 = vmatpush2.bf16.msra.mxu0 %v2293_v34  ;;  %v1246_v34 = vld [vmem:[%s3346_s5 + $0x80] sm:$0xff] }
 0x12b   :  { %1186 = vmatpush2.bf16.msra.mxu1 %v2296_v35  ;;  %1146 = vmatprep.subr.bf16.mxu0 %v2301_v36  ;;  %v1284_v35 = vld [vmem:[%s3346_s5 + $0x1b0] sm:$0xff]  ;;  %v1230_v36 = vld [vmem:[%s3346_s5] sm:$0xff] }
 0x12c   :  { %1187 = vmatprep.subr.bf16.mxu1 %v2304_v38  ;;  %v1268_v38 = vld [vmem:[%s3346_s5 + $0x130] sm:$0xff] }
 0x12e   :  { %1147 = vmatpush2.bf16.msra.mxu0 %v2299_v39  ;;  %v1283_v39 = vld [vmem:[%s3346_s5 + $0x1a8] sm:$0xff] }
 0x12f   :  { %1188 = vmatpush2.bf16.msra.mxu1 %v2302_v41  ;;  %1148 = vmatprep.subr.bf16.mxu0 %v2307_v43  ;;  %v1267_v41 = vld [vmem:[%s3346_s5 + $0x128] sm:$0xff]  ;;  %v1282_v43 = vld [vmem:[%s3346_s5 + $0x1a0] sm:$0xff] }
 0x130   :  { %1189 = vmatprep.subr.bf16.mxu1 %v2310_v44  ;;  %v1266_v44 = vld [vmem:[%s3346_s5 + $0x120] sm:$0xff] }
 0x132   :  { %1149 = vmatpush2.bf16.msra.mxu0 %v2305_v45  ;;  %v1281_v45 = vld [vmem:[%s3346_s5 + $0x198] sm:$0xff] }
 0x133   :  { %1190 = vmatpush2.bf16.msra.mxu1 %v2308_v46  ;;  %1971 = vmatprep.subr.mxu0 %v1261_v47  ;;  %v1265_v46 = vld [vmem:[%s3346_s5 + $0x118] sm:$0xff]  ;;  %v1280_v47 = vld [vmem:[%s3346_s5 + $0x190] sm:$0xff] }
 0x134   :  { %2006 = vmatprep.subr.mxu1 %v1293_v59 }
 0x135   :  { %1963 = vmatmul.mubr.msk.bf16.vlgmr.msra.gmra.mxu0 %vm2709_vm2, %v2405_v40 }
 0x136   :  { %1967 = vmatmul.mubr.msk.bf16.vlgmr.msra.gmra.mxu1 %vm2723_vm8, %v2405_v40  ;;  %1972 = vmatpush3.msra.mxu0 %v1245_v48  ;;  %v1242_v40 = vld [vmem:[%s3346_s5 + $0x60] sm:$0xff]  ;;  %v1264_v48 = vld [vmem:[%s3346_s5 + $0x110] sm:$0xff] }
 0x137   :  { %1973 = vmatprep.subr.mxu0 %v1260_v49  ;;  %2007 = vmatpush3.msra.mxu1 %v1277_v60  ;;  %v1279_v49 = vld [vmem:[%s3346_s5 + $0x188] sm:$0xff] }
 0x138   :  { %1974 = vmatpush3.msra.mxu0 %v1244_v50  ;;  %2008 = vmatprep.subr.mxu1 %v1292_v61  ;;  %v1263_v50 = vld [vmem:[%s3346_s5 + $0x108] sm:$0xff] }
 0x139   :  { %1975 = vmatprep.subr.mxu0 %v1259_v51  ;;  %2009 = vmatpush3.msra.mxu1 %v1276_v63  ;;  %v1278_v51 = vld [vmem:[%s3346_s5 + $0x180] sm:$0xff] }
 0x13a   :  { %1976 = vmatpush3.msra.mxu0 %v1243_v52  ;;  %2010 = vmatprep.subr.mxu1 %v1291_v2  ;;  %v1262_v52 = vld [vmem:[%s3346_s5 + $0x100] sm:$0xff] }
 0x13b   :  { %1977 = vmatprep.subr.mxu0 %v1258_v37  ;;  %2011 = vmatpush3.msra.mxu1 %v1275_v4  ;;  %v1200_v37 = vld [vmem:[#allocation5] sm:$0xf] }
 0x13c   :  { %1978 = vmatpush3.msra.mxu0 %v1242_v40  ;;  %2012 = vmatprep.subr.mxu1 %v1290_v6  ;;  %v1213_v4 = vrot.slane %v1200_v37, %v238_v17 }
 0x13d   :  { %1979 = vmatprep.subr.mxu0 %v1257_v42  ;;  %2013 = vmatpush3.msra.mxu1 %v1274_v8 }
 0x13e   :  { %1980 = vmatpush3.msra.mxu0 %v1241_v53  ;;  %2014 = vmatprep.subr.mxu1 %v1289_v10  ;;  %v1205_v53 = vrot.slane %v1200_v37, %v230_v16 }
 0x13f   :  { %1981 = vmatprep.subr.mxu0 %v1256_v54  ;;  %2015 = vmatpush3.msra.mxu1 %v1273_v12 }
 0x140   :  { %1982 = vmatpush3.msra.mxu0 %v1240_v55  ;;  %2016 = vmatprep.subr.mxu1 %v1288_v14 }
 0x141   :  { %1983 = vmatprep.subr.mxu0 %v1255_v56  ;;  %2017 = vmatpush3.msra.mxu1 %v1272_v21  ;;  %v1209_v56 = vrot.slane %v1200_v37, %v234_v19 }
 0x142   :  { %1984 = vmatpush3.msra.mxu0 %v1239_v57  ;;  %2018 = vmatprep.subr.mxu1 %v1287_v23  ;;  %v1437_v23 = vld [vmem:[#allocation7 + $0x8] sm:$0xff] }
 0x143   :  { %1985 = vmatprep.subr.mxu0 %v1254_v58  ;;  %2019 = vmatpush3.msra.mxu1 %v1271_v25  ;;  %v1436_v25 = vld [vmem:[#allocation7] sm:$0xff] }
 0x144   :  { %1986 = vmatpush3.msra.mxu0 %v1238_v62  ;;  %2020 = vmatprep.subr.mxu1 %v1286_v27  ;;  %v1438_v27 = vld [vmem:[#allocation7 + $0x10] sm:$0xff] }
 0x145   :  { %1987 = vmatprep.subr.mxu0 %v1253_v1  ;;  %2021 = vmatpush3.msra.mxu1 %v1270_v29 }
 0x146   :  { %1988 = vmatpush3.msra.mxu0 %v1237_v3  ;;  %2022 = vmatprep.subr.mxu1 %v1285_v31 }
 0x147   :  { %1989 = vmatprep.subr.mxu0 %v1252_v5  ;;  %2023 = vmatpush3.msra.mxu1 %v1269_v33 }
 0x148   :  { %1990 = vmatpush3.msra.mxu0 %v1236_v7  ;;  %2024 = vmatprep.subr.mxu1 %v1284_v35  ;;  %v1217_v7 = vrot.slane %v1200_v37, %v242_v20  ;;  %v1440_v20 = vld [vmem:[#allocation7 + $0x20] sm:$0xff]  ;;  %v1605_v37 = vld [vmem:[%s3348_s7 + $0x60] sm:$0xff] }
 0x149   :  { %1991 = vmatprep.subr.mxu0 %v1251_v9  ;;  %2025 = vmatpush3.msra.mxu1 %v1268_v38  ;;  %v1608_v38 = vld [vmem:[%s3348_s7 + $0x78] sm:$0xff] }
 0x14a   :  { %1992 = vmatpush3.msra.mxu0 %v1235_v11  ;;  %2026 = vmatprep.subr.mxu1 %v1283_v39  ;;  %v1640_v39 = vld [vmem:[%s3348_s7 + $0x178] sm:$0xff] }
 0x14b   :  { %1993 = vmatprep.subr.mxu0 %v1250_v13  ;;  %2027 = vmatpush3.msra.mxu1 %v1267_v41 }
 0x14c   :  { %1994 = vmatpush3.msra.mxu0 %v1234_v18  ;;  %2028 = vmatprep.subr.mxu1 %v1282_v43  ;;  %v1623_v43 = vld [vmem:[%s3348_s7 + $0xf0] sm:$0xff] }
 0x14d   :  { %1995 = vmatprep.subr.mxu0 %v1249_v22  ;;  %2029 = vmatpush3.msra.mxu1 %v1266_v44  ;;  %v1443_v22 = vld [vmem:[#allocation7 + $0x38] sm:$0xff]  ;;  %v1655_v44 = vld [vmem:[%s3348_s7 + $0x1f0] sm:$0xff] }
 0x14e   :  { %1996 = vmatpush3.msra.mxu0 %v1233_v24  ;;  %2030 = vmatprep.subr.mxu1 %v1281_v45  ;;  %v1442_v24 = vld [vmem:[#allocation7 + $0x30] sm:$0xff]  ;;  %v1607_v45 = vld [vmem:[%s3348_s7 + $0x70] sm:$0xff] }
 0x14f   :  { %1997 = vmatprep.subr.mxu0 %v1248_v26  ;;  %2031 = vmatpush3.msra.mxu1 %v1265_v46  ;;  %v1439_v26 = vld [vmem:[#allocation7 + $0x18] sm:$0xff]  ;;  %v1639_v46 = vld [vmem:[%s3348_s7 + $0x170] sm:$0xff] }
 0x150   :  { %1998 = vmatpush3.msra.mxu0 %v1232_v28  ;;  %2032 = vmatprep.subr.mxu1 %v1280_v47  ;;  %v1656_v28 = vld [vmem:[%s3348_s7 + $0x1f8] sm:$0xff]  ;;  %v1622_v47 = vld [vmem:[%s3348_s7 + $0xe8] sm:$0xff] }
 0x151   :  { %1999 = vmatprep.subr.mxu0 %v1247_v30  ;;  %2033 = vmatpush3.msra.mxu1 %v1264_v48  ;;  %v1654_v48 = vld [vmem:[%s3348_s7 + $0x1e8] sm:$0xff] }
 0x152   :  { %2000 = vmatpush3.msra.mxu0 %v1231_v32  ;;  %2034 = vmatprep.subr.mxu1 %v1279_v49  ;;  %v1606_v49 = vld [vmem:[%s3348_s7 + $0x68] sm:$0xff] }
 0x153   :  { %2001 = vmatprep.subr.mxu0 %v1246_v34  ;;  %2035 = vmatpush3.msra.mxu1 %v1263_v50  ;;  %v1638_v50 = vld [vmem:[%s3348_s7 + $0x168] sm:$0xff] }
 0x154   :  { %2002 = vmatpush3.msra.mxu0 %v1230_v36  ;;  %2036 = vmatprep.subr.mxu1 %v1278_v51  ;;  %v1621_v51 = vld [vmem:[%s3348_s7 + $0xe0] sm:$0xff] }
 0x155   :  { %2037 = vmatpush3.msra.mxu1 %v1262_v52  ;;  %1475 = vmatprep.subr.mxu0 %v1441_v15  ;;  %v1653_v52 = vld [vmem:[%s3348_s7 + $0x1e0] sm:$0xff]  ;;  %v1630_v15 = vld [vmem:[%s3348_s7 + $0x128] sm:$0xff] }
 0x156   :  { %1546 = vmatprep.subr.mxu1 %v1443_v22  ;;  %v1645_v22 = vld [vmem:[%s3348_s7 + $0x1a0] sm:$0xff] }
 0x1b5   :  { %v1070_v40 = vpop.f32.mrf.mxu0 }
 0x1b6   :  { %v1111_v42 = vpop.f32.mrf.mxu1 }
 0x1b7   :  { %v1112_v54 = vadd.f32 %v1111_v42, %v1070_v40  ;;  %v1072_v55 = vpop.f32.mrf.mxu0  ;;  %v1637_v40 = vld [vmem:[%s3348_s7 + $0x160] sm:$0xff]  ;;  %v1620_v42 = vld [vmem:[%s3348_s7 + $0xd8] sm:$0xff] }
 0x1b8   :  { %v1113_v57 = vpop.f32.mrf.mxu1 }
 0x1b9   :  { %v1114_v58 = vadd.f32 %v1113_v57, %v1072_v55  ;;  %v1074_v59 = vpop.f32.mrf.mxu0  ;;  %v3115_v60 = vmul.f32 %v1205_v53, %v1112_v54  ;;  %v1652_v53 = vld [vmem:[%s3348_s7 + $0x1d8] sm:$0xff]  ;;  %v1651_v57 = vld [vmem:[%s3348_s7 + $0x1d0] sm:$0xff] }
 0x1ba   :  { %v1115_v61 = vpop.f32.mrf.mxu1  ;;  %v1604_v54 = vld [vmem:[%s3348_s7 + $0x58] sm:$0xff]  ;;  %v1635_v59 = vld [vmem:[%s3348_s7 + $0x150] sm:$0xff] }
 0x1bb   :  { %v3117_v62 = vmul.f32 %v1209_v56, %v1114_v58  ;;  %v1075_v63 = vpop.f32.mrf.mxu0  ;;  %v1226_v16 = vmul.f32 %v3115_v60, %v3115_v60  ;;  %v1636_v55 = vld [vmem:[%s3348_s7 + $0x158] sm:$0xff]  ;;  %v1619_v56 = vld [vmem:[%s3348_s7 + $0xd0] sm:$0xff]  ;;  %v1618_v61 = vld [vmem:[%s3348_s7 + $0xc8] sm:$0xff] }
 0x1bc   :  { %v1116_v1 = vpop.f32.mrf.mxu1  ;;  %v1603_v58 = vld [vmem:[%s3348_s7 + $0x50] sm:$0xff]  ;;  %v1650_v63 = vld [vmem:[%s3348_s7 + $0x1c8] sm:$0xff] }
 0x1bd   :  { %v1227_v2 = vmul.f32 %v3117_v62, %v3117_v62  ;;  %v1602_v1 = vld [vmem:[%s3348_s7 + $0x48] sm:$0xff] }
 0x1bf   :  { %1358 = vmatprep.mubr.f32.mxu0 %v1227_v2  ;;  %v1634_v2 = vld [vmem:[%s3348_s7 + $0x148] sm:$0xff] }
 0x1c0   :  { %1359 = vmatmul.mubr.f32.vlgmr.msra.gmra.mxu0 %v1226_v16  ;;  %v1617_v16 = vld [vmem:[%s3348_s7 + $0xc0] sm:$0xff] }
 0x1c1   :  { %1511 = vmatprep.mubr.f32.mxu0 %v2404_v0  ;;  %1476 = vmatpush1.msra.mxu0 %v1440_v20  ;;  %v1613_v20 = vld [vmem:[%s3348_s7 + $0xa0] sm:$0xff] }
 0x1c2   :  { %1477 = vmatprep.subr.mxu0 %v1437_v23  ;;  %v1597_v23 = vld [vmem:[%s3348_s7 + $0x20] sm:$0xff] }
 0x1c3   :  { %1478 = vmatpush1.msra.mxu0 %v1436_v25  ;;  %v1612_v25 = vld [vmem:[%s3348_s7 + $0x98] sm:$0xff] }
 0x1f5   :  { %v1152_v19 = vpop.f32.mrf.mxu0 }
 0x1f6   :  { %v1193_v3 = vpop.f32.mrf.mxu1 }
 0x1f7   :  { %v1194_v5 = vadd.f32 %v1193_v3, %v1152_v19  ;;  %v1154_v6 = vpop.f32.mrf.mxu0  ;;  %v1649_v19 = vld [vmem:[%s3348_s7 + $0x1c0] sm:$0xff] }
 0x1f8   :  { %v1195_v8 = vpop.f32.mrf.mxu1  ;;  %v1601_v3 = vld [vmem:[%s3348_s7 + $0x40] sm:$0xff] }
 0x1f9   :  { %v1196_v9 = vadd.f32 %v1195_v8, %v1154_v6  ;;  %v1156_v10 = vpop.f32.mrf.mxu0  ;;  %v3128_v11 = vmul.f32 %v1213_v4, %v1194_v5  ;;  %v1633_v4 = vld [vmem:[%s3348_s7 + $0x140] sm:$0xff]  ;;  %v1616_v5 = vld [vmem:[%s3348_s7 + $0xb8] sm:$0xff] }
 0x1fa   :  { %v1197_v12 = vpop.f32.mrf.mxu1  ;;  %v1648_v6 = vld [vmem:[%s3348_s7 + $0x1b8] sm:$0xff]  ;;  %v1647_v10 = vld [vmem:[%s3348_s7 + $0x1b0] sm:$0xff] }
 0x1fb   :  { %v3130_v13 = vmul.f32 %v1217_v7, %v1196_v9  ;;  %v1157_v14 = vpop.f32.mrf.mxu0  ;;  %v1228_v17 = vmul.f32 %v3128_v11, %v3128_v11  ;;  %v1600_v7 = vld [vmem:[%s3348_s7 + $0x38] sm:$0xff]  ;;  %v1615_v9 = vld [vmem:[%s3348_s7 + $0xb0] sm:$0xff] }
 0x1fc   :  { %v1198_v18 = vpop.f32.mrf.mxu1  ;;  %v1632_v8 = vld [vmem:[%s3348_s7 + $0x138] sm:$0xff]  ;;  %v1599_v12 = vld [vmem:[%s3348_s7 + $0x30] sm:$0xff] }
 0x1fd   :  { %v1229_v21 = vmul.f32 %v3130_v13, %v3130_v13  ;;  %v1631_v14 = vld [vmem:[%s3348_s7 + $0x130] sm:$0xff]  ;;  %v1614_v18 = vld [vmem:[%s3348_s7 + $0xa8] sm:$0xff] }
 0x1ff   :  { %1428 = vmatprep.mubr.f32.mxu1 %v1229_v21  ;;  %v1646_v21 = vld [vmem:[%s3348_s7 + $0x1a8] sm:$0xff] }
 0x200   :  { %1429 = vmatmul.mubr.f32.vlgmr.msra.gmra.mxu1 %v1228_v17  ;;  %v1598_v17 = vld [vmem:[%s3348_s7 + $0x28] sm:$0xff] }
 0x201   :  { %1582 = vmatprep.mubr.f32.mxu1 %v2404_v0  ;;  %1547 = vmatpush1.msra.mxu1 %v1442_v24  ;;  %v1624_v0 = vld [vmem:[%s3348_s7 + $0xf8] sm:$0xff]  ;;  %v1629_v24 = vld [vmem:[%s3348_s7 + $0x120] sm:$0xff] }
 0x202   :  { %1548 = vmatprep.subr.mxu1 %v1439_v26  ;;  %2041 = vmatprep.subr.mxu0 %v1624_v0  ;;  %v1644_v26 = vld [vmem:[%s3348_s7 + $0x198] sm:$0xff] }
 0x203   :  { %1549 = vmatpush1.msra.mxu1 %v1438_v27  ;;  %v1596_v27 = vld [vmem:[%s3348_s7 + $0x18] sm:$0xff] }
 0x204   :  { %2076 = vmatprep.subr.mxu1 %v1656_v28  ;;  %v1628_v0 = vld [vmem:[%s3348_s7 + $0x118] sm:$0xff]  ;;  %v1611_v28 = vld [vmem:[%s3348_s7 + $0x90] sm:$0xff] }
 0x280   :  { %v2003_v29 = vpop.f32.mrf.mxu0 }
 0x282   :  { %v2004_v30 = vpop.f32.mrf.mxu0 }
 0x283   :  { %v2005_v33 = vadd.f32 %v2004_v30, %v2003_v29  ;;  %v1643_v29 = vld [vmem:[%s3348_s7 + $0x190] sm:$0xff] }
 0x284   :  { %v1595_v30 = vld [vmem:[%s3348_s7 + $0x10] sm:$0xff] }
 0x2c0   :  { %v2038_v31 = vpop.f32.mrf.mxu1 }
 0x2c2   :  { %v2039_v32 = vpop.f32.mrf.mxu1 }
 0x2c3   :  { %v2040_v34 = vadd.f32 %v2039_v32, %v2038_v31  ;;  %v1627_v31 = vld [vmem:[%s3348_s7 + $0x110] sm:$0xff]  ;;  %v1610_v32 = vld [vmem:[%s3348_s7 + $0x88] sm:$0xff] }
 0x2c5   :  { %v1431_v35 = vadd.f32 %v2040_v34, %v2005_v33  ;;  %v1642_v33 = vld [vmem:[%s3348_s7 + $0x188] sm:$0xff] }
 0x2c6   :  { %v1594_v34 = vld [vmem:[%s3348_s7 + $0x8] sm:$0xff] }
 0x2c7   :  { %v1434_v36 = vmax.f32 %v1431_v35, 1e-24  ;;  %v1626_v35 = vld [vmem:[%s3348_s7 + $0x108] sm:$0xff] }
 0x2c9   :  { %2311 = vrsqrt.f32 %v1434_v36  ;;  %v1609_v36 = vld [vmem:[%s3348_s7 + $0x80] sm:$0xff] }
 0x2d6   :  { %v2312_v41 = vpop.eup %2311 }
 0x2d7   :  { %1968 = vmatmul.mubr.msk.f32.vlgmr.msra.gmra.mxu0 %vm80_vm0, %v2312_v41  ;;  %1969 = vmatmul.mubr.msk.f32.vlgmr.msra.gmra.mxu1 %vm80_vm0, %v2312_v41  ;;  %v1625_v41 = vld [vmem:[%s3348_s7 + $0x100] sm:$0xff] }
 0x2d8   :  { %2042 = vmatpush3.msra.mxu0 %v1608_v38  ;;  %2077 = vmatpush3.msra.mxu1 %v1640_v39  ;;  %v1641_v38 = vld [vmem:[%s3348_s7 + $0x180] sm:$0xff] }
 0x2d9   :  { %2043 = vmatprep.subr.mxu0 %v1623_v43  ;;  %2078 = vmatprep.subr.mxu1 %v1655_v44  ;;  %v1593_v39 = vld [vmem:[%s3348_s7] sm:$0xff] }
 0x2da   :  { %2044 = vmatpush3.msra.mxu0 %v1607_v45  ;;  %2079 = vmatpush3.msra.mxu1 %v1639_v46 }
 0x2db   :  { %2045 = vmatprep.subr.mxu0 %v1622_v47  ;;  %2080 = vmatprep.subr.mxu1 %v1654_v48 }
 0x2dc   :  { %2046 = vmatpush3.msra.mxu0 %v1606_v49  ;;  %2081 = vmatpush3.msra.mxu1 %v1638_v50 }
 0x2dd   :  { %2047 = vmatprep.subr.mxu0 %v1621_v51  ;;  %2082 = vmatprep.subr.mxu1 %v1653_v52 }
 0x2de   :  { %2048 = vmatpush3.msra.mxu0 %v1605_v37  ;;  %2083 = vmatpush3.msra.mxu1 %v1637_v40  ;;  %v1970_v37 = vld [vmem:[%s3349_s8] ss:$0 sm:$0xff] }
 0x2df   :  { %2049 = vmatprep.subr.mxu0 %v1620_v42  ;;  %2084 = vmatprep.subr.mxu1 %v1652_v53 }
 0x2e0   :  { %2050 = vmatpush3.msra.mxu0 %v1604_v54  ;;  %2085 = vmatpush3.msra.mxu1 %v1636_v55 }
 0x2e1   :  { %2051 = vmatprep.subr.mxu0 %v1619_v56  ;;  %2086 = vmatprep.subr.mxu1 %v1651_v57 }
 0x2e2   :  { %2052 = vmatpush3.msra.mxu0 %v1603_v58  ;;  %2087 = vmatpush3.msra.mxu1 %v1635_v59 }
 0x2e3   :  { %2053 = vmatprep.subr.mxu0 %v1618_v61  ;;  %2088 = vmatprep.subr.mxu1 %v1650_v63 }
 0x2e4   :  { %2054 = vmatpush3.msra.mxu0 %v1602_v1  ;;  %2089 = vmatpush3.msra.mxu1 %v1634_v2 }
 0x2e5   :  { %2055 = vmatprep.subr.mxu0 %v1617_v16  ;;  %2090 = vmatprep.subr.mxu1 %v1649_v19 }
 0x2e6   :  { %2056 = vmatpush3.msra.mxu0 %v1601_v3  ;;  %2091 = vmatpush3.msra.mxu1 %v1633_v4 }
 0x2e7   :  { %2057 = vmatprep.subr.mxu0 %v1616_v5  ;;  %2092 = vmatprep.subr.mxu1 %v1648_v6 }
 0x2e8   :  { %2058 = vmatpush3.msra.mxu0 %v1600_v7  ;;  %2093 = vmatpush3.msra.mxu1 %v1632_v8 }
 0x2e9   :  { %2059 = vmatprep.subr.mxu0 %v1615_v9  ;;  %2094 = vmatprep.subr.mxu1 %v1647_v10 }
 0x2ea   :  { %2060 = vmatpush3.msra.mxu0 %v1599_v12  ;;  %2095 = vmatpush3.msra.mxu1 %v1631_v14 }
 0x2eb   :  { %2061 = vmatprep.subr.mxu0 %v1614_v18  ;;  %2096 = vmatprep.subr.mxu1 %v1646_v21 }
 0x2ec   :  { %2062 = vmatpush3.msra.mxu0 %v1598_v17  ;;  %2097 = vmatpush3.msra.mxu1 %v1630_v15 }
 0x2ed   :  { %2063 = vmatprep.subr.mxu0 %v1613_v20  ;;  %2098 = vmatprep.subr.mxu1 %v1645_v22 }
 0x2ee   :  { %2064 = vmatpush3.msra.mxu0 %v1597_v23  ;;  %2099 = vmatpush3.msra.mxu1 %v1629_v24 }
 0x2ef   :  { %2065 = vmatprep.subr.mxu0 %v1612_v25  ;;  %2100 = vmatprep.subr.mxu1 %v1644_v26 }
 0x2f0   :  { %2066 = vmatpush3.msra.mxu0 %v1596_v27  ;;  %2101 = vmatpush3.msra.mxu1 %v1628_v0 }
 0x2f1   :  { %2067 = vmatprep.subr.mxu0 %v1611_v28  ;;  %2102 = vmatprep.subr.mxu1 %v1643_v29 }
 0x2f2   :  { %2068 = vmatpush3.msra.mxu0 %v1595_v30  ;;  %2103 = vmatpush3.msra.mxu1 %v1627_v31 }
 0x2f3   :  { %2069 = vmatprep.subr.mxu0 %v1610_v32  ;;  %2104 = vmatprep.subr.mxu1 %v1642_v33 }
 0x2f4   :  { %2070 = vmatpush3.msra.mxu0 %v1594_v34  ;;  %2105 = vmatpush3.msra.mxu1 %v1626_v35 }
 0x2f5   :  { %2071 = vmatprep.subr.mxu0 %v1609_v36  ;;  %2106 = vmatprep.subr.mxu1 %v1641_v38 }
 0x2f6   :  { %2072 = vmatpush3.msra.mxu0 %v1593_v39  ;;  %2107 = vmatpush3.msra.mxu1 %v1625_v41 }
 0x397   :  { %v1513_v43 = vpop.f32.mrf.mxu0  ;;  %v1584_v44 = vpop.f32.mrf.mxu1 }
 0x398   :  { %v1589_v49 = vmul.f32 %v1513_v43, %v3115_v60  ;;  %v1591_v50 = vmul.f32 %v1584_v44, %v3128_v11 }
 0x399   :  { %v1515_v45 = vpop.f32.mrf.mxu0  ;;  %v1586_v46 = vpop.f32.mrf.mxu1 }
 0x39a   :  { %v1590_v47 = vmul.f32 %v1515_v45, %v3117_v62  ;;  %v1592_v48 = vmul.f32 %v1586_v46, %v3130_v13 }
 0x39c   :  { %1728 = vmatprep.mubr.f32.mxu0 %v1590_v47  ;;  %1798 = vmatprep.mubr.f32.mxu1 %v1592_v48 }
 0x39d   :  { %1729 = vmatmul.mubr.f32.vlgmr.msra.gmra.mxu0 %v1589_v49  ;;  %1799 = vmatmul.mubr.f32.vlgmr.msra.gmra.mxu1 %v1591_v50 }
 0x45d   :  { %v2073_v51 = vpop.f32.mrf.mxu0  ;;  %v2108_v52 = vpop.f32.mrf.mxu1 }
 0x45f   :  { %v2074_v40 = vpop.f32.mrf.mxu0  ;;  %v2109_v42 = vpop.f32.mrf.mxu1 }
 0x460   :  { %v2075_v53 = vadd.f32 %v2074_v40, %v2073_v51  ;;  %v2110_v13 = vadd.f32 %v2109_v42, %v2108_v52 }
 0x462   :  { %v1731_v62 = vadd.f32 %v2075_v53, %v1970_v37 }
 0x464   :  { %v1801_v60 = vadd.f32 %v2110_v13, %v1731_v62 }
 0x466   :  { %1805 = vst.msk [vmem:[#allocation8] sm:$0xff] %vm1804_vm9, %v1801_v60 }
 0x467   :  { %2384 = shalt.err (!%p2381_p5)
}
 0x468   :  { %1815 = dma.vmem_to_hbm [thread:$0]  %s1813_s26, 128, %s3350_s9, [#allocation4]  }
 0x469   :  { %2397 = dma.done.wait [#allocation4], 128  }
 0x46a   :  { %2398 = vsyncadd [#allocation4], 4294967168 }
 0x46b   :  { %1819 = vsyncpa [#allocation3], 1 }
 0x46c   :  { %1820 = vsyncpa [#allocation6], 1 }
 0x46d   :  { %1821 = vsyncpa [#allocation4], 1 }

</bundles_post_ra>
